<compile_context>
chip_gen: v7x
topology: tpu7x:2x2x1
jax: 0.10.0
libtpu: 0.0.40
codegen_flags: <defaults>
</compile_context>

<pallas_src>
import functools

import jax
import jax.numpy as jnp
from jax.experimental import pallas as pl
from jax.experimental.pallas import tpu as pltpu


# ----------------------------------------------------------------------------- kernels ---


def _conv_tile(x_ref, w_ref, *, kh, kw, wp, th):
    """Conv of one row-slab tile.

    x_ref: (1, Cin, L_pad) f32  -- flattened (rows x padded-width) slab, channels first.
    w_ref: (KH*KW, Cout, Cin) f32
    Returns (Cout, P) f32 with P = th * wp output positions (last (wp - W) columns of each
    row group are junk and are masked / trimmed later).
    """
    p = th * wp
    cout = w_ref.shape[1]
    acc = jnp.zeros((cout, p), jnp.float32)
    for k in range(kh * kw):
        ky, kx = divmod(k, kw)
        d = ky * wp + kx
        xs = x_ref[0, :, d:d + p]                                   # (Cin, P)
        acc = acc + jnp.dot(w_ref[k], xs, preferred_element_type=jnp.float32)
    return acc


def _stats_kernel(x_ref, w_ref, mask_ref, sum_ref, m2_ref, *, kh, kw, wp, th, wout):
    """Per-tile partial statistics of the conv output: sum and centered M2 (valid cols only)."""
    y = _conv_tile(x_ref, w_ref, kh=kh, kw=kw, wp=wp, th=th)        # (Cout, P) f32
    valid = mask_ref[...]                                           # (1, P) f32, 1.0 on real pixels
    cnt = th * wout
    s = jnp.sum(y * valid, axis=1, keepdims=True)                   # (Cout, 1)
    mu = s * (1.0 / cnt)
    c = (y - mu) * valid
    m2 = jnp.sum(c * c, axis=1, keepdims=True)                      # (Cout, 1)
    sum_ref[...] = s[None]
    m2_ref[...] = m2[None]


def _norm_kernel(x_ref, w_ref, mean_ref, inv_ref, o_ref, *, kh, kw, wp, th):
    """Recompute the conv for this tile and apply ActNorm forward: (y + bias) * exp(logs)."""
    y = _conv_tile(x_ref, w_ref, kh=kh, kw=kw, wp=wp, th=th)        # (Cout, P) f32
    o_ref[...] = ((y - mean_ref[...]) * inv_ref[...])[None]         # lane-dense (1, Cout, P)


# ----------------------------------------------------------------------------- wrapper ---


def _pick_tile_rows(h, w, max_rows=2048):
    """Largest divisor of H whose slab has at most ~max_rows output pixels."""
    th = 1
    for cand in range(1, h + 1):
        if h % cand == 0 and cand * w <= max_rows:
            th = cand
    return th


@jax.jit
def conv2d_actnorm(x, weight, logdet):
    """x: (N, Cin, H, W) f32; weight: (Cout, Cin, KH, KW) f32; logdet: scalar f32.

    Returns (out, logdet_new): out = ActNorm.forward(conv(x), reverse=False) with
    data-dependent init (bias = -mean, logs = log(1/(std+1e-6))),
    logdet_new = logdet + sum(logs) * H * W.
    """
    n, cin, h, w = x.shape
    cout, _, kh, kw = weight.shape
    ph, pw = (kh - 1) // 2, (kw - 1) // 2
    wp = w + 2 * pw                               # padded row pitch
    th = _pick_tile_rows(h, w)                    # output rows per tile
    n_th = h // th
    g = n * n_th                                  # grid size (tiles)
    p = th * wp                                   # output positions per tile (incl. junk cols)
    cnt = th * w                                  # valid pixels per tile
    m_total = n * h * w

    # --- host glue: zero-pad spatially, cut overlapping row slabs, flatten rows (no im2col).
    xp = jnp.pad(x, ((0, 0), (0, 0), (ph, ph), (pw, pw)))                   # (N,Cin,H+2ph,Wp)
    slabs = jnp.stack(
        [xp[:, :, t * th: t * th + th + 2 * ph, :] for t in range(n_th)], axis=1
    )                                                                        # (N,n_th,Cin,th+2ph,Wp)
    l = (th + 2 * ph) * wp
    x_flat = slabs.reshape(g, cin, l)
    l_need = (th + kh - 1) * wp + (kw - 1)        # max tap offset + tile span
    l_pad = ((max(l, l_need) + 7) // 8) * 8
    x_flat = jnp.pad(x_flat, ((0, 0), (0, 0), (0, l_pad - l))).astype(jnp.float32)

    # weights -> (KH*KW, Cout, Cin) so tap k gives a (Cout, Cin) matrix.
    w_t = jnp.transpose(weight, (2, 3, 0, 1)).reshape(kh * kw, cout, cin).astype(jnp.float32)

    # valid-column mask (junk columns come from the padded row pitch).
    valid = (jnp.arange(p) % wp < w).astype(jnp.float32).reshape(1, p)

    x_spec = pl.BlockSpec((1, cin, l_pad), lambda i: (i, 0, 0))
    w_spec = pl.BlockSpec((kh * kw, cout, cin), lambda i: (0, 0, 0))

    # --- pass 1: per-tile partial statistics of the conv output (independent tiles -> parallel).
    sums, m2s = pl.pallas_call(
        functools.partial(_stats_kernel, kh=kh, kw=kw, wp=wp, th=th, wout=w),
        out_shape=(jax.ShapeDtypeStruct((g, cout, 1), jnp.float32),
                   jax.ShapeDtypeStruct((g, cout, 1), jnp.float32)),
        grid=(g,),
        in_specs=[x_spec, w_spec, pl.BlockSpec((1, p), lambda i: (0, 0))],
        out_specs=(pl.BlockSpec((1, cout, 1), lambda i: (i, 0, 0)),
                   pl.BlockSpec((1, cout, 1), lambda i: (i, 0, 0))),
        compiler_params=pltpu.CompilerParams(dimension_semantics=("parallel",)),
    )(x_flat, w_t, valid)

    # --- combine per-tile stats (Chan's parallel variance; O(G*Cout) host glue).
    mean_t = sums / cnt                                                     # (G, Cout, 1)
    gmean = jnp.sum(sums, axis=0) / m_total                                 # (Cout, 1)
    m2 = jnp.sum(m2s, axis=0) + cnt * jnp.sum((mean_t - gmean) ** 2, axis=0)
    var = m2 / max(m_total - 1, 1)                                          # unbiased (torch std)
    inv_std = 1.0 / (jnp.sqrt(var) + 1e-6)                                  # exp(logs), (Cout, 1)
    logs = jnp.log(inv_std)
    dlogdet = jnp.sum(logs) * (h * w)

    # --- pass 2: recompute conv and normalize; lane-dense (Cout, P) output tiles.
    y_t = pl.pallas_call(
        functools.partial(_norm_kernel, kh=kh, kw=kw, wp=wp, th=th),
        out_shape=jax.ShapeDtypeStruct((g, cout, p), jnp.float32),
        grid=(g,),
        in_specs=[x_spec, w_spec,
                  pl.BlockSpec((cout, 1), lambda i: (0, 0)),
                  pl.BlockSpec((cout, 1), lambda i: (0, 0))],
        out_specs=pl.BlockSpec((1, cout, p), lambda i: (i, 0, 0)),
        compiler_params=pltpu.CompilerParams(dimension_semantics=("parallel",)),
    )(x_flat, w_t, gmean, inv_std)

    # --- host glue: drop junk columns, leading-axis transpose back to NCHW.
    out = y_t.reshape(n, n_th, cout, th, wp)[..., :w]
    out = jnp.transpose(out, (0, 2, 1, 3, 4)).reshape(n, cout, h, w)
    return out, logdet + dlogdet


# --------------------------------------------------------------------------- reference ---


def _reference(x, weight, logdet):
    y = jax.lax.conv_general_dilated(
        x, weight, window_strides=(1, 1), padding="SAME",
        dimension_numbers=("NCHW", "OIHW", "NCHW"))
    mean = jnp.mean(y, axis=(0, 2, 3), keepdims=True)
    std = jnp.std(y, axis=(0, 2, 3), keepdims=True, ddof=1)     # torch.std is unbiased
    logs = jnp.log(1.0 / (std + 1e-6))
    out = (y - mean) * jnp.exp(logs)
    dlogdet = jnp.sum(logs) * (y.shape[2] * y.shape[3])
    return out, logdet + dlogdet


if __name__ == "__main__":
    key = jax.random.PRNGKey(0)
    kx, kw_key = jax.random.split(key)

    N, Cin, H, W = 2, 4, 16, 16
    Cout, KH, KW = 8, 3, 3

    x = jax.random.normal(kx, (N, Cin, H, W), dtype=jnp.float32)
    # conv.weight.data.normal_(mean=0.0, std=0.05); bias disabled (norm == 'actnorm')
    weight = 0.05 * jax.random.normal(kw_key, (Cout, Cin, KH, KW), dtype=jnp.float32)
    logdet0 = jnp.zeros((), jnp.float32)

    out, logdet = conv2d_actnorm(x, weight, logdet0)
    jax.block_until_ready(out)

    ref_out, ref_logdet = _reference(x, weight, logdet0)
    assert out.shape == (N, Cout, H, W)
    max_err = float(jnp.max(jnp.abs(out - ref_out)))
    assert jnp.allclose(out, ref_out, rtol=1e-3, atol=2e-3), max_err
    assert jnp.allclose(logdet, ref_logdet, rtol=1e-4), (float(logdet), float(ref_logdet))

    print("KERNEL_OK")
</pallas_src>

<mosaic_0001>
module attributes {stable_mosaic.version = 11 : i64} {
  func.func @_stats_kernel(%arg0: i32, %arg1: memref<1x4x328xf32, #tpu.memory_space<vmem>>, %arg2: memref<9x8x4xf32, #tpu.memory_space<vmem>>, %arg3: memref<1x288xf32, #tpu.memory_space<vmem>>, %arg4: memref<1x8x1xf32, #tpu.memory_space<vmem>>, %arg5: memref<1x8x1xf32, #tpu.memory_space<vmem>>) attributes {dimension_semantics = [#tpu.dimension_semantics<parallel>], iteration_bounds = array<i64: 2>, scalar_prefetch = 0 : i64, scratch_operands = 0 : i64, tpu.core_type = #tpu.core_type<tc>, window_params = [{transform_indices = @transform_0, window_bounds = array<i64: 1, 4, 328>}, {pipeline_mode = #tpu.pipeline_mode<synchronous>, transform_indices = @transform_1, window_bounds = array<i64: 9, 8, 4>}, {pipeline_mode = #tpu.pipeline_mode<synchronous>, transform_indices = @transform_2, window_bounds = array<i64: 1, 288>}, {transform_indices = @transform_3, window_bounds = array<i64: 1, 8, 1>}, {transform_indices = @transform_4, window_bounds = array<i64: 1, 8, 1>}]} {
    %cst = arith.constant 0.000000e+00 : f32
    %0 = vector.broadcast %cst : f32 to vector<8x288xf32>
    %c0 = arith.constant 0 : index
    %c0_0 = arith.constant 0 : index
    %c0_1 = arith.constant 0 : index
    %1 = vector.load %arg1[%c0, %c0_0, %c0_1] : memref<1x4x328xf32, #tpu.memory_space<vmem>>, vector<1x4x288xf32>
    %2 = vector.shape_cast %1 : vector<1x4x288xf32> to vector<4x288xf32>
    %c0_2 = arith.constant 0 : index
    %c0_3 = arith.constant 0 : index
    %c0_4 = arith.constant 0 : index
    %3 = vector.load %arg2[%c0_2, %c0_3, %c0_4] : memref<9x8x4xf32, #tpu.memory_space<vmem>>, vector<1x8x4xf32>
    %4 = vector.shape_cast %3 : vector<1x8x4xf32> to vector<8x4xf32>
    %cst_5 = arith.constant dense<0.000000e+00> : vector<8x288xf32>
    %5 = tpu.matmul %4, %2, %cst_5 {dimension_numbers = #tpu.dot_dimension_numbers<[1], [0], [0], [1], [0, 0, 1, 1], [], []>} : vector<8x4xf32>, vector<4x288xf32>, vector<8x288xf32> -> vector<8x288xf32>
    %6 = arith.addf %0, %5 : vector<8x288xf32>
    %c0_6 = arith.constant 0 : index
    %c0_7 = arith.constant 0 : index
    %c1 = arith.constant 1 : index
    %7 = vector.load %arg1[%c0_6, %c0_7, %c1] : memref<1x4x328xf32, #tpu.memory_space<vmem>>, vector<1x4x288xf32>
    %8 = vector.shape_cast %7 : vector<1x4x288xf32> to vector<4x288xf32>
    %c1_8 = arith.constant 1 : index
    %c0_9 = arith.constant 0 : index
    %c0_10 = arith.constant 0 : index
    %9 = vector.load %arg2[%c1_8, %c0_9, %c0_10] : memref<9x8x4xf32, #tpu.memory_space<vmem>>, vector<1x8x4xf32>
    %10 = vector.shape_cast %9 : vector<1x8x4xf32> to vector<8x4xf32>
    %cst_11 = arith.constant dense<0.000000e+00> : vector<8x288xf32>
    %11 = tpu.matmul %10, %8, %cst_11 {dimension_numbers = #tpu.dot_dimension_numbers<[1], [0], [0], [1], [0, 0, 1, 1], [], []>} : vector<8x4xf32>, vector<4x288xf32>, vector<8x288xf32> -> vector<8x288xf32>
    %12 = arith.addf %6, %11 : vector<8x288xf32>
    %c0_12 = arith.constant 0 : index
    %c0_13 = arith.constant 0 : index
    %c2 = arith.constant 2 : index
    %13 = vector.load %arg1[%c0_12, %c0_13, %c2] : memref<1x4x328xf32, #tpu.memory_space<vmem>>, vector<1x4x288xf32>
    %14 = vector.shape_cast %13 : vector<1x4x288xf32> to vector<4x288xf32>
    %c2_14 = arith.constant 2 : index
    %c0_15 = arith.constant 0 : index
    %c0_16 = arith.constant 0 : index
    %15 = vector.load %arg2[%c2_14, %c0_15, %c0_16] : memref<9x8x4xf32, #tpu.memory_space<vmem>>, vector<1x8x4xf32>
    %16 = vector.shape_cast %15 : vector<1x8x4xf32> to vector<8x4xf32>
    %cst_17 = arith.constant dense<0.000000e+00> : vector<8x288xf32>
    %17 = tpu.matmul %16, %14, %cst_17 {dimension_numbers = #tpu.dot_dimension_numbers<[1], [0], [0], [1], [0, 0, 1, 1], [], []>} : vector<8x4xf32>, vector<4x288xf32>, vector<8x288xf32> -> vector<8x288xf32>
    %18 = arith.addf %12, %17 : vector<8x288xf32>
    %c0_18 = arith.constant 0 : index
    %c0_19 = arith.constant 0 : index
    %c18 = arith.constant 18 : index
    %19 = vector.load %arg1[%c0_18, %c0_19, %c18] : memref<1x4x328xf32, #tpu.memory_space<vmem>>, vector<1x4x288xf32>
    %20 = vector.shape_cast %19 : vector<1x4x288xf32> to vector<4x288xf32>
    %c3 = arith.constant 3 : index
    %c0_20 = arith.constant 0 : index
    %c0_21 = arith.constant 0 : index
    %21 = vector.load %arg2[%c3, %c0_20, %c0_21] : memref<9x8x4xf32, #tpu.memory_space<vmem>>, vector<1x8x4xf32>
    %22 = vector.shape_cast %21 : vector<1x8x4xf32> to vector<8x4xf32>
    %cst_22 = arith.constant dense<0.000000e+00> : vector<8x288xf32>
    %23 = tpu.matmul %22, %20, %cst_22 {dimension_numbers = #tpu.dot_dimension_numbers<[1], [0], [0], [1], [0, 0, 1, 1], [], []>} : vector<8x4xf32>, vector<4x288xf32>, vector<8x288xf32> -> vector<8x288xf32>
    %24 = arith.addf %18, %23 : vector<8x288xf32>
    %c0_23 = arith.constant 0 : index
    %c0_24 = arith.constant 0 : index
    %c19 = arith.constant 19 : index
    %25 = vector.load %arg1[%c0_23, %c0_24, %c19] : memref<1x4x328xf32, #tpu.memory_space<vmem>>, vector<1x4x288xf32>
    %26 = vector.shape_cast %25 : vector<1x4x288xf32> to vector<4x288xf32>
    %c4 = arith.constant 4 : index
    %c0_25 = arith.constant 0 : index
    %c0_26 = arith.constant 0 : index
    %27 = vector.load %arg2[%c4, %c0_25, %c0_26] : memref<9x8x4xf32, #tpu.memory_space<vmem>>, vector<1x8x4xf32>
    %28 = vector.shape_cast %27 : vector<1x8x4xf32> to vector<8x4xf32>
    %cst_27 = arith.constant dense<0.000000e+00> : vector<8x288xf32>
    %29 = tpu.matmul %28, %26, %cst_27 {dimension_numbers = #tpu.dot_dimension_numbers<[1], [0], [0], [1], [0, 0, 1, 1], [], []>} : vector<8x4xf32>, vector<4x288xf32>, vector<8x288xf32> -> vector<8x288xf32>
    %30 = arith.addf %24, %29 : vector<8x288xf32>
    %c0_28 = arith.constant 0 : index
    %c0_29 = arith.constant 0 : index
    %c20 = arith.constant 20 : index
    %31 = vector.load %arg1[%c0_28, %c0_29, %c20] : memref<1x4x328xf32, #tpu.memory_space<vmem>>, vector<1x4x288xf32>
    %32 = vector.shape_cast %31 : vector<1x4x288xf32> to vector<4x288xf32>
    %c5 = arith.constant 5 : index
    %c0_30 = arith.constant 0 : index
    %c0_31 = arith.constant 0 : index
    %33 = vector.load %arg2[%c5, %c0_30, %c0_31] : memref<9x8x4xf32, #tpu.memory_space<vmem>>, vector<1x8x4xf32>
    %34 = vector.shape_cast %33 : vector<1x8x4xf32> to vector<8x4xf32>
    %cst_32 = arith.constant dense<0.000000e+00> : vector<8x288xf32>
    %35 = tpu.matmul %34, %32, %cst_32 {dimension_numbers = #tpu.dot_dimension_numbers<[1], [0], [0], [1], [0, 0, 1, 1], [], []>} : vector<8x4xf32>, vector<4x288xf32>, vector<8x288xf32> -> vector<8x288xf32>
    %36 = arith.addf %30, %35 : vector<8x288xf32>
    %c0_33 = arith.constant 0 : index
    %c0_34 = arith.constant 0 : index
    %c36 = arith.constant 36 : index
    %37 = vector.load %arg1[%c0_33, %c0_34, %c36] : memref<1x4x328xf32, #tpu.memory_space<vmem>>, vector<1x4x288xf32>
    %38 = vector.shape_cast %37 : vector<1x4x288xf32> to vector<4x288xf32>
    %c6 = arith.constant 6 : index
    %c0_35 = arith.constant 0 : index
    %c0_36 = arith.constant 0 : index
    %39 = vector.load %arg2[%c6, %c0_35, %c0_36] : memref<9x8x4xf32, #tpu.memory_space<vmem>>, vector<1x8x4xf32>
    %40 = vector.shape_cast %39 : vector<1x8x4xf32> to vector<8x4xf32>
    %cst_37 = arith.constant dense<0.000000e+00> : vector<8x288xf32>
    %41 = tpu.matmul %40, %38, %cst_37 {dimension_numbers = #tpu.dot_dimension_numbers<[1], [0], [0], [1], [0, 0, 1, 1], [], []>} : vector<8x4xf32>, vector<4x288xf32>, vector<8x288xf32> -> vector<8x288xf32>
    %42 = arith.addf %36, %41 : vector<8x288xf32>
    %c0_38 = arith.constant 0 : index
    %c0_39 = arith.constant 0 : index
    %c37 = arith.constant 37 : index
    %43 = vector.load %arg1[%c0_38, %c0_39, %c37] : memref<1x4x328xf32, #tpu.memory_space<vmem>>, vector<1x4x288xf32>
    %44 = vector.shape_cast %43 : vector<1x4x288xf32> to vector<4x288xf32>
    %c7 = arith.constant 7 : index
    %c0_40 = arith.constant 0 : index
    %c0_41 = arith.constant 0 : index
    %45 = vector.load %arg2[%c7, %c0_40, %c0_41] : memref<9x8x4xf32, #tpu.memory_space<vmem>>, vector<1x8x4xf32>
    %46 = vector.shape_cast %45 : vector<1x8x4xf32> to vector<8x4xf32>
    %cst_42 = arith.constant dense<0.000000e+00> : vector<8x288xf32>
    %47 = tpu.matmul %46, %44, %cst_42 {dimension_numbers = #tpu.dot_dimension_numbers<[1], [0], [0], [1], [0, 0, 1, 1], [], []>} : vector<8x4xf32>, vector<4x288xf32>, vector<8x288xf32> -> vector<8x288xf32>
    %48 = arith.addf %42, %47 : vector<8x288xf32>
    %c0_43 = arith.constant 0 : index
    %c0_44 = arith.constant 0 : index
    %c38 = arith.constant 38 : index
    %49 = vector.load %arg1[%c0_43, %c0_44, %c38] : memref<1x4x328xf32, #tpu.memory_space<vmem>>, vector<1x4x288xf32>
    %50 = vector.shape_cast %49 : vector<1x4x288xf32> to vector<4x288xf32>
    %c8 = arith.constant 8 : index
    %c0_45 = arith.constant 0 : index
    %c0_46 = arith.constant 0 : index
    %51 = vector.load %arg2[%c8, %c0_45, %c0_46] : memref<9x8x4xf32, #tpu.memory_space<vmem>>, vector<1x8x4xf32>
    %52 = vector.shape_cast %51 : vector<1x8x4xf32> to vector<8x4xf32>
    %cst_47 = arith.constant dense<0.000000e+00> : vector<8x288xf32>
    %53 = tpu.matmul %52, %50, %cst_47 {dimension_numbers = #tpu.dot_dimension_numbers<[1], [0], [0], [1], [0, 0, 1, 1], [], []>} : vector<8x4xf32>, vector<4x288xf32>, vector<8x288xf32> -> vector<8x288xf32>
    %54 = arith.addf %48, %53 : vector<8x288xf32>
    %c0_48 = arith.constant 0 : index
    %c0_49 = arith.constant 0 : index
    %55 = vector.load %arg3[%c0_48, %c0_49] : memref<1x288xf32, #tpu.memory_space<vmem>>, vector<1x288xf32>
    %56 = vector.broadcast %55 : vector<1x288xf32> to vector<8x288xf32>
    %57 = arith.mulf %54, %56 : vector<8x288xf32>
    %cst_50 = arith.constant dense<0.000000e+00> : vector<8xf32>
    %58 = vector.multi_reduction <add>, %57, %cst_50 [1] : vector<8x288xf32> to vector<8xf32>
    %59 = vector.shape_cast %58 : vector<8xf32> to vector<8x1xf32>
    %cst_51 = arith.constant 3.906250e-03 : f32
    %60 = vector.broadcast %cst_51 : f32 to vector<8x1xf32>
    %61 = arith.mulf %59, %60 : vector<8x1xf32>
    %62 = vector.broadcast %61 : vector<8x1xf32> to vector<8x288xf32>
    %63 = arith.subf %54, %62 : vector<8x288xf32>
    %64 = vector.broadcast %55 : vector<1x288xf32> to vector<8x288xf32>
    %65 = arith.mulf %63, %64 : vector<8x288xf32>
    %66 = arith.mulf %65, %65 : vector<8x288xf32>
    %cst_52 = arith.constant dense<0.000000e+00> : vector<8xf32>
    %67 = vector.multi_reduction <add>, %66, %cst_52 [1] : vector<8x288xf32> to vector<8xf32>
    %68 = vector.shape_cast %67 : vector<8xf32> to vector<8x1xf32>
    %69 = vector.shape_cast %59 : vector<8x1xf32> to vector<1x8x1xf32>
    %c0_53 = arith.constant 0 : index
    %c0_54 = arith.constant 0 : index
    %c0_55 = arith.constant 0 : index
    %70 = vector.load %arg4[%c0_53, %c0_54, %c0_55] : memref<1x8x1xf32, #tpu.memory_space<vmem>>, vector<1x8x1xf32>
    tpu.vector_store %arg4[%c0_53, %c0_54, %c0_55], %69 {strides = array<i32>} : memref<1x8x1xf32, #tpu.memory_space<vmem>>, vector<1x8x1xf32>,
    %71 = vector.shape_cast %68 : vector<8x1xf32> to vector<1x8x1xf32>
    %c0_56 = arith.constant 0 : index
    %c0_57 = arith.constant 0 : index
    %c0_58 = arith.constant 0 : index
    %72 = vector.load %arg5[%c0_56, %c0_57, %c0_58] : memref<1x8x1xf32, #tpu.memory_space<vmem>>, vector<1x8x1xf32>
    tpu.vector_store %arg5[%c0_56, %c0_57, %c0_58], %71 {strides = array<i32>} : memref<1x8x1xf32, #tpu.memory_space<vmem>>, vector<1x8x1xf32>,
    return
  }
  func.func @transform_0(%arg0: i32) -> (i32, i32, i32) {
    %c0_i32 = arith.constant 0 : i32
    %c0_i32_0 = arith.constant 0 : i32
    %c0_i32_1 = arith.constant 0 : i32
    return %arg0, %c0_i32, %c0_i32_0 : i32, i32, i32
  }
  func.func @transform_1(%arg0: i32) -> (i32, i32, i32) {
    %c0_i32 = arith.constant 0 : i32
    %c0_i32_0 = arith.constant 0 : i32
    %c0_i32_1 = arith.constant 0 : i32
    %c0_i32_2 = arith.constant 0 : i32
    return %c0_i32, %c0_i32_0, %c0_i32_1 : i32, i32, i32
  }
  func.func @transform_2(%arg0: i32) -> (i32, i32) {
    %c0_i32 = arith.constant 0 : i32
    %c0_i32_0 = arith.constant 0 : i32
    %c0_i32_1 = arith.constant 0 : i32
    return %c0_i32, %c0_i32_0 : i32, i32
  }
  func.func @transform_3(%arg0: i32) -> (i32, i32, i32) {
    %c0_i32 = arith.constant 0 : i32
    %c0_i32_0 = arith.constant 0 : i32
    %c0_i32_1 = arith.constant 0 : i32
    return %arg0, %c0_i32, %c0_i32_0 : i32, i32, i32
  }
  func.func @transform_4(%arg0: i32) -> (i32, i32, i32) {
    %c0_i32 = arith.constant 0 : i32
    %c0_i32_0 = arith.constant 0 : i32
    %c0_i32_1 = arith.constant 0 : i32
    return %arg0, %c0_i32, %c0_i32_0 : i32, i32, i32
  }
}

module attributes {stable_mosaic.version = 11 : i64} {
  func.func @_norm_kernel(%arg0: i32, %arg1: memref<1x4x328xf32, #tpu.memory_space<vmem>>, %arg2: memref<9x8x4xf32, #tpu.memory_space<vmem>>, %arg3: memref<8x1xf32, #tpu.memory_space<vmem>>, %arg4: memref<8x1xf32, #tpu.memory_space<vmem>>, %arg5: memref<1x8x288xf32, #tpu.memory_space<vmem>>) attributes {dimension_semantics = [#tpu.dimension_semantics<parallel>], iteration_bounds = array<i64: 2>, scalar_prefetch = 0 : i64, scratch_operands = 0 : i64, tpu.core_type = #tpu.core_type<tc>, window_params = [{transform_indices = @transform_0, window_bounds = array<i64: 1, 4, 328>}, {pipeline_mode = #tpu.pipeline_mode<synchronous>, transform_indices = @transform_1, window_bounds = array<i64: 9, 8, 4>}, {pipeline_mode = #tpu.pipeline_mode<synchronous>, transform_indices = @transform_2, window_bounds = array<i64: 8, 1>}, {pipeline_mode = #tpu.pipeline_mode<synchronous>, transform_indices = @transform_3, window_bounds = array<i64: 8, 1>}, {transform_indices = @transform_4, window_bounds = array<i64: 1, 8, 288>}]} {
    %cst = arith.constant 0.000000e+00 : f32
    %0 = vector.broadcast %cst : f32 to vector<8x288xf32>
    %c0 = arith.constant 0 : index
    %c0_0 = arith.constant 0 : index
    %c0_1 = arith.constant 0 : index
    %1 = vector.load %arg1[%c0, %c0_0, %c0_1] : memref<1x4x328xf32, #tpu.memory_space<vmem>>, vector<1x4x288xf32>
    %2 = vector.shape_cast %1 : vector<1x4x288xf32> to vector<4x288xf32>
    %c0_2 = arith.constant 0 : index
    %c0_3 = arith.constant 0 : index
    %c0_4 = arith.constant 0 : index
    %3 = vector.load %arg2[%c0_2, %c0_3, %c0_4] : memref<9x8x4xf32, #tpu.memory_space<vmem>>, vector<1x8x4xf32>
    %4 = vector.shape_cast %3 : vector<1x8x4xf32> to vector<8x4xf32>
    %cst_5 = arith.constant dense<0.000000e+00> : vector<8x288xf32>
    %5 = tpu.matmul %4, %2, %cst_5 {dimension_numbers = #tpu.dot_dimension_numbers<[1], [0], [0], [1], [0, 0, 1, 1], [], []>} : vector<8x4xf32>, vector<4x288xf32>, vector<8x288xf32> -> vector<8x288xf32>
    %6 = arith.addf %0, %5 : vector<8x288xf32>
    %c0_6 = arith.constant 0 : index
    %c0_7 = arith.constant 0 : index
    %c1 = arith.constant 1 : index
    %7 = vector.load %arg1[%c0_6, %c0_7, %c1] : memref<1x4x328xf32, #tpu.memory_space<vmem>>, vector<1x4x288xf32>
    %8 = vector.shape_cast %7 : vector<1x4x288xf32> to vector<4x288xf32>
    %c1_8 = arith.constant 1 : index
    %c0_9 = arith.constant 0 : index
    %c0_10 = arith.constant 0 : index
    %9 = vector.load %arg2[%c1_8, %c0_9, %c0_10] : memref<9x8x4xf32, #tpu.memory_space<vmem>>, vector<1x8x4xf32>
    %10 = vector.shape_cast %9 : vector<1x8x4xf32> to vector<8x4xf32>
    %cst_11 = arith.constant dense<0.000000e+00> : vector<8x288xf32>
    %11 = tpu.matmul %10, %8, %cst_11 {dimension_numbers = #tpu.dot_dimension_numbers<[1], [0], [0], [1], [0, 0, 1, 1], [], []>} : vector<8x4xf32>, vector<4x288xf32>, vector<8x288xf32> -> vector<8x288xf32>
    %12 = arith.addf %6, %11 : vector<8x288xf32>
    %c0_12 = arith.constant 0 : index
    %c0_13 = arith.constant 0 : index
    %c2 = arith.constant 2 : index
    %13 = vector.load %arg1[%c0_12, %c0_13, %c2] : memref<1x4x328xf32, #tpu.memory_space<vmem>>, vector<1x4x288xf32>
    %14 = vector.shape_cast %13 : vector<1x4x288xf32> to vector<4x288xf32>
    %c2_14 = arith.constant 2 : index
    %c0_15 = arith.constant 0 : index
    %c0_16 = arith.constant 0 : index
    %15 = vector.load %arg2[%c2_14, %c0_15, %c0_16] : memref<9x8x4xf32, #tpu.memory_space<vmem>>, vector<1x8x4xf32>
    %16 = vector.shape_cast %15 : vector<1x8x4xf32> to vector<8x4xf32>
    %cst_17 = arith.constant dense<0.000000e+00> : vector<8x288xf32>
    %17 = tpu.matmul %16, %14, %cst_17 {dimension_numbers = #tpu.dot_dimension_numbers<[1], [0], [0], [1], [0, 0, 1, 1], [], []>} : vector<8x4xf32>, vector<4x288xf32>, vector<8x288xf32> -> vector<8x288xf32>
    %18 = arith.addf %12, %17 : vector<8x288xf32>
    %c0_18 = arith.constant 0 : index
    %c0_19 = arith.constant 0 : index
    %c18 = arith.constant 18 : index
    %19 = vector.load %arg1[%c0_18, %c0_19, %c18] : memref<1x4x328xf32, #tpu.memory_space<vmem>>, vector<1x4x288xf32>
    %20 = vector.shape_cast %19 : vector<1x4x288xf32> to vector<4x288xf32>
    %c3 = arith.constant 3 : index
    %c0_20 = arith.constant 0 : index
    %c0_21 = arith.constant 0 : index
    %21 = vector.load %arg2[%c3, %c0_20, %c0_21] : memref<9x8x4xf32, #tpu.memory_space<vmem>>, vector<1x8x4xf32>
    %22 = vector.shape_cast %21 : vector<1x8x4xf32> to vector<8x4xf32>
    %cst_22 = arith.constant dense<0.000000e+00> : vector<8x288xf32>
    %23 = tpu.matmul %22, %20, %cst_22 {dimension_numbers = #tpu.dot_dimension_numbers<[1], [0], [0], [1], [0, 0, 1, 1], [], []>} : vector<8x4xf32>, vector<4x288xf32>, vector<8x288xf32> -> vector<8x288xf32>
    %24 = arith.addf %18, %23 : vector<8x288xf32>
    %c0_23 = arith.constant 0 : index
    %c0_24 = arith.constant 0 : index
    %c19 = arith.constant 19 : index
    %25 = vector.load %arg1[%c0_23, %c0_24, %c19] : memref<1x4x328xf32, #tpu.memory_space<vmem>>, vector<1x4x288xf32>
    %26 = vector.shape_cast %25 : vector<1x4x288xf32> to vector<4x288xf32>
    %c4 = arith.constant 4 : index
    %c0_25 = arith.constant 0 : index
    %c0_26 = arith.constant 0 : index
    %27 = vector.load %arg2[%c4, %c0_25, %c0_26] : memref<9x8x4xf32, #tpu.memory_space<vmem>>, vector<1x8x4xf32>
    %28 = vector.shape_cast %27 : vector<1x8x4xf32> to vector<8x4xf32>
    %cst_27 = arith.constant dense<0.000000e+00> : vector<8x288xf32>
    %29 = tpu.matmul %28, %26, %cst_27 {dimension_numbers = #tpu.dot_dimension_numbers<[1], [0], [0], [1], [0, 0, 1, 1], [], []>} : vector<8x4xf32>, vector<4x288xf32>, vector<8x288xf32> -> vector<8x288xf32>
    %30 = arith.addf %24, %29 : vector<8x288xf32>
    %c0_28 = arith.constant 0 : index
    %c0_29 = arith.constant 0 : index
    %c20 = arith.constant 20 : index
    %31 = vector.load %arg1[%c0_28, %c0_29, %c20] : memref<1x4x328xf32, #tpu.memory_space<vmem>>, vector<1x4x288xf32>
    %32 = vector.shape_cast %31 : vector<1x4x288xf32> to vector<4x288xf32>
    %c5 = arith.constant 5 : index
    %c0_30 = arith.constant 0 : index
    %c0_31 = arith.constant 0 : index
    %33 = vector.load %arg2[%c5, %c0_30, %c0_31] : memref<9x8x4xf32, #tpu.memory_space<vmem>>, vector<1x8x4xf32>
    %34 = vector.shape_cast %33 : vector<1x8x4xf32> to vector<8x4xf32>
    %cst_32 = arith.constant dense<0.000000e+00> : vector<8x288xf32>
    %35 = tpu.matmul %34, %32, %cst_32 {dimension_numbers = #tpu.dot_dimension_numbers<[1], [0], [0], [1], [0, 0, 1, 1], [], []>} : vector<8x4xf32>, vector<4x288xf32>, vector<8x288xf32> -> vector<8x288xf32>
    %36 = arith.addf %30, %35 : vector<8x288xf32>
    %c0_33 = arith.constant 0 : index
    %c0_34 = arith.constant 0 : index
    %c36 = arith.constant 36 : index
    %37 = vector.load %arg1[%c0_33, %c0_34, %c36] : memref<1x4x328xf32, #tpu.memory_space<vmem>>, vector<1x4x288xf32>
    %38 = vector.shape_cast %37 : vector<1x4x288xf32> to vector<4x288xf32>
    %c6 = arith.constant 6 : index
    %c0_35 = arith.constant 0 : index
    %c0_36 = arith.constant 0 : index
    %39 = vector.load %arg2[%c6, %c0_35, %c0_36] : memref<9x8x4xf32, #tpu.memory_space<vmem>>, vector<1x8x4xf32>
    %40 = vector.shape_cast %39 : vector<1x8x4xf32> to vector<8x4xf32>
    %cst_37 = arith.constant dense<0.000000e+00> : vector<8x288xf32>
    %41 = tpu.matmul %40, %38, %cst_37 {dimension_numbers = #tpu.dot_dimension_numbers<[1], [0], [0], [1], [0, 0, 1, 1], [], []>} : vector<8x4xf32>, vector<4x288xf32>, vector<8x288xf32> -> vector<8x288xf32>
    %42 = arith.addf %36, %41 : vector<8x288xf32>
    %c0_38 = arith.constant 0 : index
    %c0_39 = arith.constant 0 : index
    %c37 = arith.constant 37 : index
    %43 = vector.load %arg1[%c0_38, %c0_39, %c37] : memref<1x4x328xf32, #tpu.memory_space<vmem>>, vector<1x4x288xf32>
    %44 = vector.shape_cast %43 : vector<1x4x288xf32> to vector<4x288xf32>
    %c7 = arith.constant 7 : index
    %c0_40 = arith.constant 0 : index
    %c0_41 = arith.constant 0 : index
    %45 = vector.load %arg2[%c7, %c0_40, %c0_41] : memref<9x8x4xf32, #tpu.memory_space<vmem>>, vector<1x8x4xf32>
    %46 = vector.shape_cast %45 : vector<1x8x4xf32> to vector<8x4xf32>
    %cst_42 = arith.constant dense<0.000000e+00> : vector<8x288xf32>
    %47 = tpu.matmul %46, %44, %cst_42 {dimension_numbers = #tpu.dot_dimension_numbers<[1], [0], [0], [1], [0, 0, 1, 1], [], []>} : vector<8x4xf32>, vector<4x288xf32>, vector<8x288xf32> -> vector<8x288xf32>
    %48 = arith.addf %42, %47 : vector<8x288xf32>
    %c0_43 = arith.constant 0 : index
    %c0_44 = arith.constant 0 : index
    %c38 = arith.constant 38 : index
    %49 = vector.load %arg1[%c0_43, %c0_44, %c38] : memref<1x4x328xf32, #tpu.memory_space<vmem>>, vector<1x4x288xf32>
    %50 = vector.shape_cast %49 : vector<1x4x288xf32> to vector<4x288xf32>
    %c8 = arith.constant 8 : index
    %c0_45 = arith.constant 0 : index
    %c0_46 = arith.constant 0 : index
    %51 = vector.load %arg2[%c8, %c0_45, %c0_46] : memref<9x8x4xf32, #tpu.memory_space<vmem>>, vector<1x8x4xf32>
    %52 = vector.shape_cast %51 : vector<1x8x4xf32> to vector<8x4xf32>
    %cst_47 = arith.constant dense<0.000000e+00> : vector<8x288xf32>
    %53 = tpu.matmul %52, %50, %cst_47 {dimension_numbers = #tpu.dot_dimension_numbers<[1], [0], [0], [1], [0, 0, 1, 1], [], []>} : vector<8x4xf32>, vector<4x288xf32>, vector<8x288xf32> -> vector<8x288xf32>
    %54 = arith.addf %48, %53 : vector<8x288xf32>
    %c0_48 = arith.constant 0 : index
    %c0_49 = arith.constant 0 : index
    %55 = vector.load %arg3[%c0_48, %c0_49] : memref<8x1xf32, #tpu.memory_space<vmem>>, vector<8x1xf32>
    %56 = vector.broadcast %55 : vector<8x1xf32> to vector<8x288xf32>
    %57 = arith.subf %54, %56 : vector<8x288xf32>
    %c0_50 = arith.constant 0 : index
    %c0_51 = arith.constant 0 : index
    %58 = vector.load %arg4[%c0_50, %c0_51] : memref<8x1xf32, #tpu.memory_space<vmem>>, vector<8x1xf32>
    %59 = vector.broadcast %58 : vector<8x1xf32> to vector<8x288xf32>
    %60 = arith.mulf %57, %59 : vector<8x288xf32>
    %61 = vector.shape_cast %60 : vector<8x288xf32> to vector<1x8x288xf32>
    %c0_52 = arith.constant 0 : index
    %c0_53 = arith.constant 0 : index
    %c0_54 = arith.constant 0 : index
    %62 = vector.load %arg5[%c0_52, %c0_53, %c0_54] : memref<1x8x288xf32, #tpu.memory_space<vmem>>, vector<1x8x288xf32>
    tpu.vector_store %arg5[%c0_52, %c0_53, %c0_54], %61 {strides = array<i32>} : memref<1x8x288xf32, #tpu.memory_space<vmem>>, vector<1x8x288xf32>,
    return
  }
  func.func @transform_0(%arg0: i32) -> (i32, i32, i32) {
    %c0_i32 = arith.constant 0 : i32
    %c0_i32_0 = arith.constant 0 : i32
    %c0_i32_1 = arith.constant 0 : i32
    return %arg0, %c0_i32, %c0_i32_0 : i32, i32, i32
  }
  func.func @transform_1(%arg0: i32) -> (i32, i32, i32) {
    %c0_i32 = arith.constant 0 : i32
    %c0_i32_0 = arith.constant 0 : i32
    %c0_i32_1 = arith.constant 0 : i32
    %c0_i32_2 = arith.constant 0 : i32
    return %c0_i32, %c0_i32_0, %c0_i32_1 : i32, i32, i32
  }
  func.func @transform_2(%arg0: i32) -> (i32, i32) {
    %c0_i32 = arith.constant 0 : i32
    %c0_i32_0 = arith.constant 0 : i32
    %c0_i32_1 = arith.constant 0 : i32
    return %c0_i32, %c0_i32_0 : i32, i32
  }
  func.func @transform_3(%arg0: i32) -> (i32, i32) {
    %c0_i32 = arith.constant 0 : i32
    %c0_i32_0 = arith.constant 0 : i32
    %c0_i32_1 = arith.constant 0 : i32
    return %c0_i32, %c0_i32_0 : i32, i32
  }
  func.func @transform_4(%arg0: i32) -> (i32, i32, i32) {
    %c0_i32 = arith.constant 0 : i32
    %c0_i32_0 = arith.constant 0 : i32
    %c0_i32_1 = arith.constant 0 : i32
    return %arg0, %c0_i32, %c0_i32_0 : i32, i32, i32
  }
}

</mosaic_0001>

<bundles_post_ra>
// kernel: conv2d_actnorm.3
= control target key start
LH: loop header
LB: loop body
LE: loop exit
PB: predicated region body
PF: predicated region fallthrough
CT: control target
= control target key end

     0   :  { %s2002_s15 = smov 0   ;;  %s2188_s0 = inlined_call_operand.vmem [shape: f32[2,4,328], index: 0, kind: input, shape index: {}]   ;;  %s2189_s1 = inlined_call_operand.vmem [shape: f32[9,8,4], index: 1, kind: input, shape index: {}]   ;;  %s2190_s2 = inlined_call_operand.vmem [shape: f32[8,1], index: 2, kind: input, shape index: {}]   ;;  %s2191_s3 = inlined_call_operand.vmem [shape: f32[8,1], index: 3, kind: input, shape index: {}]   ;;  %s2192_s4 = inlined_call_operand.vmem [shape: f32[2,8,288], index: 4, kind: output, shape index: {}]  }
   0x1 LB: > { %s1777_s16 = sadd.s32 4294967295, %s1964_s15   ;;  %p1781_p0 = scmp.ge.s32.totalorder %s1964_s15, 1  ;;  %s1964_s15 = sphi %s2002_s15, %s14_s15  }
   0x2   : > { %p162_p1 = scmp.lt.s32.totalorder %s1964_s15, 3 }
   0x4   : > { %p163_p2 = pnand %p1781_p0, %p162_p1 }
   0x5   : > { %p188_p3 = scmp.lt.s32.totalorder (!%p163_p2), %s1777_s16, 1  ;;  %v1966_v0 = vmov (!%p163_p2), 0.0   ;;  %vm1967_vm0 = vmmov (!%p163_p2), 0   ;;  %s1968_s21 = smov (!%p163_p2), 127   ;;  %v1700_v11 = vld [vmem:[%s2190_s2] sm:$0xff] (!%p163_p2)  ;;  %v1976_v13 = vmov (!%p163_p2), 0  }
   0x6   : > { %166 = sbr.rel (%p163_p2) target bundleno = 424 (0x1a8), region = 36  ;;  %1857 = vmatprep.subr.mxu1 (!%p163_p2), %v1966_v0  ;;  %1859 = vmatprep.mubr.msk.f32.mxu1 (!%p163_p2), %vm1967_vm0, %v1966_v0  ;;  %s1969_s22 = smov (!%p163_p2), 126   ;;  %v1709_v12 = vld [vmem:[%s2191_s3] sm:$0xff] (!%p163_p2)  ;;  %vm219_vm1 = vcmask (!%p163_p2), 1043456   ;;  %vm212_vm2 = vcmask (!%p163_p2), 1039360   ;;  %v1784_v17 = vld [vmem:[%s2189_s1 + $0x8] sm:$0xff] (!%p163_p2) }
   0x7   : > { %290 = vmatprep.mubr.f32.mxu0 (!%p163_p2), %v1966_v0  ;;  %s1970_s23 = smov (!%p163_p2), 110   ;;  %s1971_s24 = smov (!%p163_p2), 109   ;;  %1955 = vset.pattern.permute.xlu0 (!%p163_p2), %v1976_v13  ;;  %vm215_vm3 = vcmask (!%p163_p2), 31744   ;;  %vm530_vm4 = vcmask (!%p163_p2), 1031168   ;;  %v200_v24 = vld [vmem:[%s2189_s1] sm:$0xff] (!%p163_p2)  ;;  %vm699_vm5 = vcmask (!%p163_p2), 900096  }
   0x8   : > { %s1972_s25 = smov (!%p163_p2), 108   ;;  %s1973_s26 = smov (!%p163_p2), 92   ;;  %1956 = vset.pattern.permute.xlu1 (!%p163_p2), %v1976_v13  ;;  %v1795_v31 = vld [vmem:[%s2189_s1 + $0x10] sm:$0xff] (!%p163_p2)  ;;  %vm868_vm6 = vcmask (!%p163_p2), 891904   ;;  %v1801_v37 = vld [vmem:[%s2189_s1 + $0x18] sm:$0xff] (!%p163_p2)  ;;  %vm1037_vm7 = vcmask (!%p163_p2), 883712  }
   0x9   : > { %s1974_s27 = smov (!%p163_p2), 91   ;;  %s1975_s28 = smov (!%p163_p2), 90   ;;  %v1807_v43 = vld [vmem:[%s2189_s1 + $0x20] sm:$0xff] (!%p163_p2)  ;;  %vm1206_vm8 = vcmask (!%p163_p2), 752640   ;;  %v1813_v49 = vld [vmem:[%s2189_s1 + $0x28] sm:$0xff] (!%p163_p2)  ;;  %vm1375_vm9 = vcmask (!%p163_p2), 744448  }
   0xa   : > { %v1819_v54 = vld [vmem:[%s2189_s1 + $0x30] sm:$0xff] (!%p163_p2)  ;;  %vm1544_vm10 = vcmask (!%p163_p2), 736256   ;;  %v1825_v60 = vld [vmem:[%s2189_s1 + $0x38] sm:$0xff] (!%p163_p2)  ;;  %v1831_v62 = vld [vmem:[%s2189_s1 + $0x40] sm:$0xff] (!%p163_p2)  ;;  %vm1720_vm11 = vcmask (!%p163_p2), 261120  }
   0xd   : > { %s2194_s16 = smov (!%p188_p3, %s1777_s16), 1 }
   0xe   : > { %s1934_s17 = smul.u32 12, %s2194_s16 }
  0x10   : > { %s2020_s20 = scalar_lea.vmem %s2188_s0, %s1934_s17 }
  0x11   : > { %v2023_v1 = vld [vmem:[%s2020_s20] sm:$0xff]  ;;  %v2032_v3 = vld [vmem:[%s2020_s20 + $0x8] sm:$0xf] }
  0x12   : > { %206 = vrot.lane.b32.xlu1 %v2023_v1, %s1968_s21  ;;  %v2028_v2 = vcombine.high %v2023_v1, %v2023_v1  ;;  %v518_v4 = vld [vmem:[%s2020_s20 + $0x8] sm:$0xf] }
  0x13   : > { %v687_v5 = vld [vmem:[%s2020_s20 + $0x8] sm:$0xf] }
  0x14   : > { %208 = vrot.lane.b32.xlu0 %v2028_v2, %s1968_s21  ;;  %v856_v6 = vld [vmem:[%s2020_s20 + $0x8] sm:$0xf] }
  0x15   : > { %v1025_v7 = vld [vmem:[%s2020_s20 + $0x8] sm:$0xf] }
  0x16   : > { %526 = vrot.lane.b32.xlu1 %v2028_v2, %s1969_s22  ;;  %v1194_v8 = vld [vmem:[%s2020_s20 + $0x8] sm:$0xf] }
  0x17   : > { %v1363_v9 = vld [vmem:[%s2020_s20 + $0x8] sm:$0xf] }
  0x18   : > { %210 = vrot.lane.b32.xlu0 %v2032_v3, %s1968_s21  ;;  %v1532_v10 = vld [vmem:[%s2020_s20 + $0x8] sm:$0xf] }
  0x1a   : > { %524 = vrot.lane.b32.xlu1 %v2023_v1, %s1969_s22 }
  0x1c   : > { %528 = vrot.lane.b32.xlu0 %v518_v4, %s1969_s22 }
  0x1e   : > { %697 = vrot.lane.b32.xlu1 %v687_v5, %s1970_s23 }
  0x20   : > { %695 = vrot.lane.b32.xlu0 %v2028_v2, %s1970_s23 }
  0x22   : > { %864 = vrot.lane.b32.xlu1 %v2028_v2, %s1971_s24 }
  0x24   : > { %693 = vrot.lane.b32.xlu0 %v2023_v1, %s1970_s23 }
  0x26   : > { %862 = vrot.lane.b32.xlu1 %v2023_v1, %s1971_s24 }
  0x28   : > { %866 = vrot.lane.b32.xlu0 %v856_v6, %s1971_s24 }
  0x2a   : > { %1035 = vrot.lane.b32.xlu1 %v1025_v7, %s1972_s25 }
  0x2c   : > { %1033 = vrot.lane.b32.xlu0 %v2028_v2, %s1972_s25 }
  0x2e   : > { %1202 = vrot.lane.b32.xlu1 %v2028_v2, %s1973_s26 }
  0x30   : > { %1031 = vrot.lane.b32.xlu0 %v2023_v1, %s1972_s25 }
  0x32   : > { %1200 = vrot.lane.b32.xlu1 %v2023_v1, %s1973_s26 }
  0x34   : > { %1204 = vrot.lane.b32.xlu0 %v1194_v8, %s1973_s26 }
  0x36   : > { %1373 = vrot.lane.b32.xlu1 %v1363_v9, %s1974_s27 }
  0x38   : > { %1371 = vrot.lane.b32.xlu0 %v2028_v2, %s1974_s27 }
  0x3a   : > { %1540 = vrot.lane.b32.xlu1 %v2028_v2, %s1975_s28 }
  0x3c   : > { %1369 = vrot.lane.b32.xlu0 %v2023_v1, %s1974_s27  ;;  %s1935_s27 = smul.u32 24, %s2194_s16 }
  0x3e   : > { %1538 = vrot.lane.b32.xlu1 %v2023_v1, %s1975_s28  ;;  %s197_s30 = scalar_lea.vmem %s2192_s4, %s1935_s27 }
  0x40   : > { %1542 = vrot.lane.b32.xlu0 %v1532_v10, %s1975_s28 }
  0x42   : > { %1712 = vperm.xlu1 %1956, %v1709_v12  }
  0x44   : > { %1703 = vperm.xlu0 %1955, %v1700_v11  }
  0x84   : > { %v207_v14 = vpop.permute.xlu1 %206 }
  0x86   : > { %v209_v15 = vpop.permute.xlu0 %208 }
  0x87   : > { %v213_v20 = vsel %vm212_vm2, %v207_v14, %v209_v15 }
  0x88   : > { %v527_v16 = vpop.permute.xlu1 %526 }
  0x8a   : > { %v211_v18 = vpop.permute.xlu0 %210 }
  0x8b   : > { %1858 = vmatpush3.msk.msra.mxu1 %vm219_vm1, %v211_v18  ;;  %v214_v19 = vsel %vm212_vm2, %v209_v15, %v211_v18 }
  0x8c   : > { %1785 = vmatprep.subr.msk.mxu0 %vm219_vm1, %v214_v19  ;;  %1860 = vmatmul.mubr.msk.f32.vlgmr.msra.gmra.mrb[0].mxu1 %vm215_vm3, %v1784_v17  ;;  %v525_v21 = vpop.permute.xlu1 %524 }
  0x8d   : > { %1786 = vmatpush1.msk.msra.mxu0 %vm219_vm1, %v213_v20  ;;  %1862 = vmatprep.subr.mxu1 %v1966_v0  ;;  %v531_v27 = vsel %vm530_vm4, %v525_v21, %v527_v16 }
  0x8e   : > { %1787 = vmatmul.mubr.msk.f32.vlgmr.msra.gmra.mrb[0].mxu0 %vm215_vm3, %v1784_v17  ;;  %1790 = vmatprep.subr.msk.mxu0 %vm219_vm1, %v2028_v2  ;;  %v529_v22 = vpop.permute.xlu0 %528 }
  0x8f   : > { %1791 = vmatpush1.msk.msra.mxu0 %vm219_vm1, %v2023_v1  ;;  %1863 = vmatpush3.msk.msra.mxu1 %vm219_vm1, %v2032_v3  ;;  %v532_v23 = vsel %vm530_vm4, %v527_v16, %v529_v22 }
  0x90   : > { %1864 = vmatprep.mubr.msk.f32.mxu1 %vm1967_vm0, %v1966_v0  ;;  %1796 = vmatprep.subr.msk.mxu0 %vm219_vm1, %v532_v23  ;;  %v698_v26 = vpop.permute.xlu1 %697 }
  0x91   : > { %1867 = vmatprep.subr.mxu1 %v1966_v0  ;;  %440 = vmatprep.mubr.f32.mxu0 %v1966_v0 }
  0x92   : > { %v696_v25 = vpop.permute.xlu0 %695 }
  0x93   : > { %v701_v28 = vsel %vm699_vm5, %v696_v25, %v698_v26 }
  0x94   : > { %1865 = vmatmul.mubr.msk.f32.vlgmr.msra.gmra.mrb[0].mxu1 %vm215_vm3, %v200_v24  ;;  %v865_v30 = vpop.permute.xlu1 %864 }
  0x95   : > { %1868 = vmatpush3.msk.msra.mxu1 %vm219_vm1, %v529_v22  ;;  %1869 = vmatprep.mubr.msk.f32.mxu1 %vm1967_vm0, %v1966_v0 }
  0x96   : > { %1792 = vmatmul.mubr.msk.f32.vlgmr.msra.gmra.mrb[0].mxu0 %vm215_vm3, %v200_v24  ;;  %v694_v29 = vpop.permute.xlu0 %693  ;;  %1872 = vmatprep.subr.mxu1 %v1966_v0 }
  0x97   : > { %1797 = vmatpush1.msk.msra.mxu0 %vm219_vm1, %v531_v27  ;;  %606 = vmatprep.mubr.f32.mxu0 %v1966_v0  ;;  %v700_v33 = vsel %vm699_vm5, %v694_v29, %v696_v25 }
  0x98   : > { %1802 = vmatprep.subr.msk.mxu0 %vm219_vm1, %v701_v28  ;;  %v863_v35 = vpop.permute.xlu1 %862 }
  0x99   : > { %v869_v39 = vsel %vm868_vm6, %v863_v35, %v865_v30 }
  0x9a   : > { %v867_v32 = vpop.permute.xlu0 %866 }
  0x9b   : > { %v870_v34 = vsel %vm868_vm6, %v865_v30, %v867_v32 }
  0x9c   : > { %1870 = vmatmul.mubr.msk.f32.vlgmr.msra.gmra.mrb[0].mxu1 %vm215_vm3, %v1795_v31  ;;  %v1036_v38 = vpop.permute.xlu1 %1035 }
  0x9d   : > { %1873 = vmatpush3.msk.msra.mxu1 %vm219_vm1, %v698_v26  ;;  %1874 = vmatprep.mubr.msk.f32.mxu1 %vm1967_vm0, %v1966_v0 }
  0x9e   : > { %1798 = vmatmul.mubr.msk.f32.vlgmr.msra.gmra.mrb[0].mxu0 %vm215_vm3, %v1795_v31  ;;  %1877 = vmatprep.subr.mxu1 %v1966_v0  ;;  %v1034_v36 = vpop.permute.xlu0 %1033 }
  0x9f   : > { %1803 = vmatpush1.msk.msra.mxu0 %vm219_vm1, %v700_v33  ;;  %775 = vmatprep.mubr.f32.mxu0 %v1966_v0  ;;  %v1039_v40 = vsel %vm1037_vm7, %v1034_v36, %v1036_v38 }
  0xa0   : > { %1808 = vmatprep.subr.msk.mxu0 %vm219_vm1, %v870_v34  ;;  %v1203_v42 = vpop.permute.xlu1 %1202 }
  0xa2   : > { %v1032_v41 = vpop.permute.xlu0 %1031 }
  0xa3   : > { %v1038_v45 = vsel %vm1037_vm7, %v1032_v41, %v1034_v36 }
  0xa4   : > { %1875 = vmatmul.mubr.msk.f32.vlgmr.msra.gmra.mrb[0].mxu1 %vm215_vm3, %v1801_v37  ;;  %v1201_v47 = vpop.permute.xlu1 %1200 }
  0xa5   : > { %1878 = vmatpush3.msk.msra.mxu1 %vm219_vm1, %v867_v32  ;;  %1879 = vmatprep.mubr.msk.f32.mxu1 %vm1967_vm0, %v1966_v0  ;;  %v1207_v51 = vsel %vm1206_vm8, %v1201_v47, %v1203_v42 }
  0xa6   : > { %1804 = vmatmul.mubr.msk.f32.vlgmr.msra.gmra.mrb[0].mxu0 %vm215_vm3, %v1801_v37  ;;  %1882 = vmatprep.subr.mxu1 %v1966_v0  ;;  %v1205_v44 = vpop.permute.xlu0 %1204 }
  0xa7   : > { %1809 = vmatpush1.msk.msra.mxu0 %vm219_vm1, %v869_v39  ;;  %944 = vmatprep.mubr.f32.mxu0 %v1966_v0  ;;  %v1208_v46 = vsel %vm1206_vm8, %v1203_v42, %v1205_v44 }
  0xa8   : > { %1814 = vmatprep.subr.msk.mxu0 %vm219_vm1, %v1039_v40  ;;  %v1374_v50 = vpop.permute.xlu1 %1373 }
  0xaa   : > { %v1372_v48 = vpop.permute.xlu0 %1371 }
  0xab   : > { %v1377_v52 = vsel %vm1375_vm9, %v1372_v48, %v1374_v50 }
  0xac   : > { %1880 = vmatmul.mubr.msk.f32.vlgmr.msra.gmra.mrb[0].mxu1 %vm215_vm3, %v1807_v43  ;;  %v1541_v56 = vpop.permute.xlu1 %1540 }
  0xad   : > { %1883 = vmatpush3.msk.msra.mxu1 %vm219_vm1, %v1036_v38  ;;  %1884 = vmatprep.mubr.msk.f32.mxu1 %vm1967_vm0, %v1966_v0 }
  0xae   : > { %1810 = vmatmul.mubr.msk.f32.vlgmr.msra.gmra.mrb[0].mxu0 %vm215_vm3, %v1807_v43  ;;  %1887 = vmatprep.subr.mxu1 %v1966_v0  ;;  %v1370_v53 = vpop.permute.xlu0 %1369 }
  0xaf   : > { %1815 = vmatpush1.msk.msra.mxu0 %vm219_vm1, %v1038_v45  ;;  %1113 = vmatprep.mubr.f32.mxu0 %v1966_v0  ;;  %v1376_v57 = vsel %vm1375_vm9, %v1370_v53, %v1372_v48 }
  0xb0   : > { %1820 = vmatprep.subr.msk.mxu0 %vm219_vm1, %v1208_v46  ;;  %v1539_v59 = vpop.permute.xlu1 %1538 }
  0xb1   : > { %v1545_v61 = vsel %vm1544_vm10, %v1539_v59, %v1541_v56 }
  0xb2   : > { %v1543_v55 = vpop.permute.xlu0 %1542 }
  0xb3   : > { %v1546_v58 = vsel %vm1544_vm10, %v1541_v56, %v1543_v55 }
  0xb4   : > { %1885 = vmatmul.mubr.msk.f32.vlgmr.msra.gmra.mrb[0].mxu1 %vm215_vm3, %v1813_v49 }
  0xb5   : > { %1888 = vmatpush3.msk.msra.mxu1 %vm219_vm1, %v1205_v44  ;;  %1889 = vmatprep.mubr.msk.f32.mxu1 %vm1967_vm0, %v1966_v0 }
  0xb6   : > { %1816 = vmatmul.mubr.msk.f32.vlgmr.msra.gmra.mrb[0].mxu0 %vm215_vm3, %v1813_v49  ;;  %1892 = vmatprep.subr.mxu1 %v1966_v0 }
  0xb7   : > { %1821 = vmatpush1.msk.msra.mxu0 %vm219_vm1, %v1207_v51  ;;  %1282 = vmatprep.mubr.f32.mxu0 %v1966_v0 }
  0xb8   : > { %1826 = vmatprep.subr.msk.mxu0 %vm219_vm1, %v1377_v52 }
  0xbc   : > { %1890 = vmatmul.mubr.msk.f32.vlgmr.msra.gmra.mrb[0].mxu1 %vm215_vm3, %v1819_v54 }
  0xbd   : > { %1893 = vmatpush3.msk.msra.mxu1 %vm219_vm1, %v1374_v50  ;;  %1894 = vmatprep.mubr.msk.f32.mxu1 %vm1967_vm0, %v1966_v0 }
  0xbe   : > { %1822 = vmatmul.mubr.msk.f32.vlgmr.msra.gmra.mrb[0].mxu0 %vm215_vm3, %v1819_v54  ;;  %1897 = vmatprep.subr.mxu1 %v1966_v0 }
  0xbf   : > { %1827 = vmatpush1.msk.msra.mxu0 %vm219_vm1, %v1376_v57  ;;  %1451 = vmatprep.mubr.f32.mxu0 %v1966_v0 }
  0xc0   : > { %1832 = vmatprep.subr.msk.mxu0 %vm219_vm1, %v1546_v58 }
  0xc1   : > { %v1713_v2 = vpop.permute.xlu1 %1712 }
  0xc3   : > { %v1704_v63 = vpop.permute.xlu0 %1703 }
  0xc4   : > { %1895 = vmatmul.mubr.msk.f32.vlgmr.msra.gmra.mrb[0].mxu1 %vm215_vm3, %v1825_v60 }
  0xc5   : > { %1898 = vmatpush3.msk.msra.mxu1 %vm219_vm1, %v1543_v55  ;;  %1899 = vmatprep.mubr.msk.f32.mxu1 %vm1967_vm0, %v1966_v0 }
  0xc6   : > { %1828 = vmatmul.mubr.msk.f32.vlgmr.msra.gmra.mrb[0].mxu0 %vm215_vm3, %v1825_v60 }
  0xc7   : > { %1833 = vmatpush1.msk.msra.mxu0 %vm219_vm1, %v1545_v61  ;;  %1620 = vmatprep.mubr.f32.mxu0 %v1966_v0 }
  0xcc   : > { %1900 = vmatmul.mubr.msk.f32.vlgmr.msra.gmra.mrb[0].mxu1 %vm215_vm3, %v1831_v62 }
  0xce   : > { %1834 = vmatmul.mubr.msk.f32.vlgmr.msra.gmra.mrb[0].mxu0 %vm215_vm3, %v1831_v62 }
 0x19f   : > { %v1693_v1 = vpop.f32.mrb[0].mxu1 }
 0x1a0   : > { %v1708_v3 = vsub.f32 %v1693_v1, %v1704_v63  ;;  %v1901_v4 = vpop.f32.mrb[1].mxu1 }
 0x1a1   : > { %v1622_v0 = vpop.f32.mrb[0].mxu0 }
 0x1a2   : > { %v1717_v5 = vmul.f32 %v1713_v2, %v1708_v3  ;;  %v1706_v6 = vsub.f32 %v1622_v0, %v1704_v63  ;;  %v1624_v7 = vpop.f32.mrb[1].mxu0 }
 0x1a3   : > { %v1707_v8 = vsub.f32 %v1624_v7, %v1704_v63 }
 0x1a4   : > { %1721 = vst.msk [vmem:[%s197_s30 + $0x10] sm:$0xff] %vm1720_vm11, %v1717_v5  ;;  %v1715_v9 = vmul.f32 %v1713_v2, %v1706_v6 }
 0x1a5   : > { %v1716_v10 = vmul.f32 %v1713_v2, %v1707_v8 }
 0x1a6   : > { %1718 = vst [vmem:[%s197_s30] sm:$0xff] %v1715_v9 }
 0x1a7   : > { %1719 = vst [vmem:[%s197_s30 + $0x8] sm:$0xff] %v1716_v10 }
 0x1a8 PF: > { %s14_s15 = sadd.s32 1, %s1964_s15  }
 0x1a9   : > { %p11_p4 = scmp.ge.s32.totalorder %s14_s15, 4  }
 0x1ab   :  { %13 = sbr.rel (!%p11_p4) target bundleno = 1 (0x1), region = 74 }

// kernel: conv2d_actnorm.2
= control target key start
LH: loop header
LB: loop body
LE: loop exit
PB: predicated region body
PF: predicated region fallthrough
CT: control target
= control target key end

     0   :  { %s2058_s15 = smov 0   ;;  %s2220_s0 = inlined_call_operand.vmem [shape: f32[2,4,328], index: 0, kind: input, shape index: {}]   ;;  %s2221_s1 = inlined_call_operand.vmem [shape: f32[9,8,4], index: 1, kind: input, shape index: {}]   ;;  %s2222_s2 = inlined_call_operand.vmem [shape: f32[1,288], index: 2, kind: input, shape index: {}]   ;;  %s2223_s3 = inlined_call_operand.vmem [shape: f32[2,8,1], index: 3, kind: output, shape index: {0}]   ;;  %s2224_s4 = inlined_call_operand.vmem [shape: f32[2,8,1], index: 4, kind: output, shape index: {1}]  }
   0x1 LB: > { %s1837_s16 = sadd.s32 4294967295, %s2021_s15   ;;  %p1841_p0 = scmp.ge.s32.totalorder %s2021_s15, 1  ;;  %s2021_s15 = sphi %s2058_s15, %s15_s15  }
   0x2   : > { %p165_p1 = scmp.lt.s32.totalorder %s2021_s15, 3 }
   0x4   : > { %p166_p2 = pnand %p1841_p0, %p165_p1 }
   0x5   : > { %p194_p3 = scmp.lt.s32.totalorder (!%p166_p2), %s1837_s16, 1  ;;  %v2023_v0 = vmov (!%p166_p2), 0.0   ;;  %vm2024_vm0 = vmmov (!%p166_p2), 0   ;;  %s2025_s21 = smov (!%p166_p2), 127   ;;  %vm228_vm1 = vcmask (!%p166_p2), 1043456   ;;  %vm221_vm2 = vcmask (!%p166_p2), 1039360  }
   0x6   : > { %169 = sbr.rel (%p166_p2) target bundleno = 722 (0x2d2), region = 32  ;;  %1918 = vmatprep.subr.mxu1 (!%p166_p2), %v2023_v0  ;;  %1920 = vmatprep.mubr.msk.f32.mxu1 (!%p166_p2), %vm2024_vm0, %v2023_v0  ;;  %s2026_s22 = smov (!%p166_p2), 126   ;;  %v1845_v14 = vld [vmem:[%s2221_s1 + $0x8] sm:$0xff] (!%p166_p2)  ;;  %vm224_vm3 = vcmask (!%p166_p2), 31744   ;;  %vm539_vm4 = vcmask (!%p166_p2), 1031168   ;;  %v209_v21 = vld [vmem:[%s2221_s1] sm:$0xff] (!%p166_p2)  ;;  %v1711_v60 = vlaneseq (!%p166_p2) }
   0x7   : > { %299 = vmatprep.mubr.f32.mxu0 (!%p166_p2), %v2023_v0  ;;  %s2027_s23 = smov (!%p166_p2), 110   ;;  %s2028_s24 = smov (!%p166_p2), 109   ;;  %vm708_vm5 = vcmask (!%p166_p2), 900096   ;;  %v1856_v28 = vld [vmem:[%s2221_s1 + $0x10] sm:$0xff] (!%p166_p2)  ;;  %vm877_vm6 = vcmask (!%p166_p2), 891904   ;;  %v1862_v34 = vld [vmem:[%s2221_s1 + $0x18] sm:$0xff] (!%p166_p2) }
   0x8   : > { %s2029_s25 = smov (!%p166_p2), 108   ;;  %s2030_s26 = smov (!%p166_p2), 92   ;;  %vm1046_vm7 = vcmask (!%p166_p2), 883712   ;;  %v1868_v40 = vld [vmem:[%s2221_s1 + $0x20] sm:$0xff] (!%p166_p2)  ;;  %vm1215_vm8 = vcmask (!%p166_p2), 752640   ;;  %v1874_v46 = vld [vmem:[%s2221_s1 + $0x28] sm:$0xff] (!%p166_p2) }
   0x9   : > { %s2031_s27 = smov (!%p166_p2), 91   ;;  %s2032_s28 = smov (!%p166_p2), 90   ;;  %vm1384_vm9 = vcmask (!%p166_p2), 744448   ;;  %v1880_v51 = vld [vmem:[%s2221_s1 + $0x30] sm:$0xff] (!%p166_p2)  ;;  %vm1553_vm10 = vcmask (!%p166_p2), 736256   ;;  %v1886_v57 = vld [vmem:[%s2221_s1 + $0x38] sm:$0xff] (!%p166_p2) }
   0xa   : > { %v1892_v59 = vld [vmem:[%s2221_s1 + $0x40] sm:$0xff] (!%p166_p2)  ;;  %v1712_v61 = vshrl.u32 (!%p166_p2), %v1711_v60, 7  ;;  %vm1730_vm11 = vcmask (!%p166_p2), 261120   ;;  %vm1750_vm12 = vcmask (!%p166_p2), 7168  }
   0xc   : > { %v1721_v62 = vsub.s32 (!%p166_p2), 2, %v1712_v61  ;;  %v1713_v63 = vsub.s32 (!%p166_p2), 0, %v1712_v61 }
   0xd   : > { %s2226_s16 = smov (!%p194_p3, %s1837_s16), 1 }
   0xe   : > { %s1995_s17 = smul.u32 12, %s2226_s16 }
  0x10   : > { %s2076_s20 = scalar_lea.vmem %s2220_s0, %s1995_s17 }
  0x11   : > { %v207_v1 = vld [vmem:[%s2076_s20] sm:$0xff]  ;;  %v208_v3 = vld [vmem:[%s2076_s20 + $0x8] sm:$0xf] }
  0x12   : > { %215 = vrot.lane.b32.xlu1 %v207_v1, %s2025_s21  ;;  %v214_v2 = vcombine.high %v207_v1, %v207_v1  ;;  %v527_v4 = vld [vmem:[%s2076_s20 + $0x8] sm:$0xf] }
  0x13   : > { %v696_v5 = vld [vmem:[%s2076_s20 + $0x8] sm:$0xf] }
  0x14   : > { %217 = vrot.lane.b32.xlu0 %v214_v2, %s2025_s21  ;;  %v865_v6 = vld [vmem:[%s2076_s20 + $0x8] sm:$0xf] }
  0x15   : > { %v1034_v7 = vld [vmem:[%s2076_s20 + $0x8] sm:$0xf] }
  0x16   : > { %535 = vrot.lane.b32.xlu1 %v214_v2, %s2026_s22  ;;  %v1203_v8 = vld [vmem:[%s2076_s20 + $0x8] sm:$0xf] }
  0x17   : > { %v1372_v9 = vld [vmem:[%s2076_s20 + $0x8] sm:$0xf] }
  0x18   : > { %219 = vrot.lane.b32.xlu0 %v208_v3, %s2025_s21  ;;  %v1541_v10 = vld [vmem:[%s2076_s20 + $0x8] sm:$0xf] }
  0x1a   : > { %533 = vrot.lane.b32.xlu1 %v207_v1, %s2026_s22 }
  0x1c   : > { %537 = vrot.lane.b32.xlu0 %v527_v4, %s2026_s22 }
  0x1e   : > { %706 = vrot.lane.b32.xlu1 %v696_v5, %s2027_s23 }
  0x20   : > { %704 = vrot.lane.b32.xlu0 %v214_v2, %s2027_s23 }
  0x22   : > { %873 = vrot.lane.b32.xlu1 %v214_v2, %s2028_s24 }
  0x24   : > { %702 = vrot.lane.b32.xlu0 %v207_v1, %s2027_s23 }
  0x26   : > { %871 = vrot.lane.b32.xlu1 %v207_v1, %s2028_s24 }
  0x28   : > { %875 = vrot.lane.b32.xlu0 %v865_v6, %s2028_s24 }
  0x2a   : > { %1044 = vrot.lane.b32.xlu1 %v1034_v7, %s2029_s25 }
  0x2c   : > { %1042 = vrot.lane.b32.xlu0 %v214_v2, %s2029_s25 }
  0x2e   : > { %1211 = vrot.lane.b32.xlu1 %v214_v2, %s2030_s26 }
  0x30   : > { %1040 = vrot.lane.b32.xlu0 %v207_v1, %s2029_s25  ;;  %s1843_s25 = sshll.u32 %s2226_s16, 3 }
  0x31   : > { %s206_s30 = scalar_lea.vmem %s2224_s4, %s1843_s25 }
  0x32   : > { %1209 = vrot.lane.b32.xlu1 %v207_v1, %s2030_s26 }
  0x34   : > { %1213 = vrot.lane.b32.xlu0 %v1203_v8, %s2030_s26 }
  0x36   : > { %1382 = vrot.lane.b32.xlu1 %v1372_v9, %s2031_s27 }
  0x38   : > { %1380 = vrot.lane.b32.xlu0 %v214_v2, %s2031_s27 }
  0x3a   : > { %1549 = vrot.lane.b32.xlu1 %v214_v2, %s2032_s28 }
  0x3c   : > { %1378 = vrot.lane.b32.xlu0 %v207_v1, %s2031_s27 }
  0x3e   : > { %1547 = vrot.lane.b32.xlu1 %v207_v1, %s2032_s28 }
  0x40   : > { %1551 = vrot.lane.b32.xlu0 %v1541_v10, %s2032_s28  ;;  %s202_s28 = scalar_lea.vmem %s2223_s3, %s1843_s25 }
  0x84   : > { %v216_v11 = vpop.permute.xlu1 %215 }
  0x86   : > { %v218_v12 = vpop.permute.xlu0 %217 }
  0x87   : > { %v222_v17 = vsel %vm221_vm2, %v216_v11, %v218_v12 }
  0x88   : > { %v536_v13 = vpop.permute.xlu1 %535 }
  0x8a   : > { %v220_v15 = vpop.permute.xlu0 %219 }
  0x8b   : > { %1919 = vmatpush3.msk.msra.mxu1 %vm228_vm1, %v220_v15  ;;  %v223_v16 = vsel %vm221_vm2, %v218_v12, %v220_v15 }
  0x8c   : > { %1846 = vmatprep.subr.msk.mxu0 %vm228_vm1, %v223_v16  ;;  %1921 = vmatmul.mubr.msk.f32.vlgmr.msra.gmra.mrb[0].mxu1 %vm224_vm3, %v1845_v14  ;;  %v534_v18 = vpop.permute.xlu1 %533 }
  0x8d   : > { %1847 = vmatpush1.msk.msra.mxu0 %vm228_vm1, %v222_v17  ;;  %1923 = vmatprep.subr.mxu1 %v2023_v0  ;;  %v540_v24 = vsel %vm539_vm4, %v534_v18, %v536_v13 }
  0x8e   : > { %1848 = vmatmul.mubr.msk.f32.vlgmr.msra.gmra.mrb[0].mxu0 %vm224_vm3, %v1845_v14  ;;  %1851 = vmatprep.subr.msk.mxu0 %vm228_vm1, %v214_v2  ;;  %v538_v19 = vpop.permute.xlu0 %537  ;;  %v1717_v2 = vsub.s32 1, %v1712_v61 }
  0x8f   : > { %1852 = vmatpush1.msk.msra.mxu0 %vm228_vm1, %v207_v1  ;;  %1924 = vmatpush3.msk.msra.mxu1 %vm228_vm1, %v208_v3  ;;  %v541_v20 = vsel %vm539_vm4, %v536_v13, %v538_v19  ;;  %v1709_v1 = vld [vmem:[%s2222_s2] sm:$0x7] }
  0x90   : > { %1925 = vmatprep.mubr.msk.f32.mxu1 %vm2024_vm0, %v2023_v0  ;;  %1857 = vmatprep.subr.msk.mxu0 %vm228_vm1, %v541_v20  ;;  %v707_v23 = vpop.permute.xlu1 %706  ;;  %v1722_v3 = vrot.slane %v1709_v1, %v1721_v62  ;;  %v1718_v5 = vrot.slane %v1709_v1, %v1717_v2 }
  0x91   : > { %1928 = vmatprep.subr.mxu1 %v2023_v0  ;;  %449 = vmatprep.mubr.f32.mxu0 %v2023_v0 }
  0x92   : > { %v705_v22 = vpop.permute.xlu0 %704 }
  0x93   : > { %v710_v25 = vsel %vm708_vm5, %v705_v22, %v707_v23 }
  0x94   : > { %1926 = vmatmul.mubr.msk.f32.vlgmr.msra.gmra.mrb[0].mxu1 %vm224_vm3, %v209_v21  ;;  %v874_v27 = vpop.permute.xlu1 %873 }
  0x95   : > { %1929 = vmatpush3.msk.msra.mxu1 %vm228_vm1, %v538_v19  ;;  %1930 = vmatprep.mubr.msk.f32.mxu1 %vm2024_vm0, %v2023_v0 }
  0x96   : > { %1853 = vmatmul.mubr.msk.f32.vlgmr.msra.gmra.mrb[0].mxu0 %vm224_vm3, %v209_v21  ;;  %v703_v26 = vpop.permute.xlu0 %702  ;;  %1933 = vmatprep.subr.mxu1 %v2023_v0 }
  0x97   : > { %1858 = vmatpush1.msk.msra.mxu0 %vm228_vm1, %v540_v24  ;;  %615 = vmatprep.mubr.f32.mxu0 %v2023_v0  ;;  %v709_v30 = vsel %vm708_vm5, %v703_v26, %v705_v22 }
  0x98   : > { %1863 = vmatprep.subr.msk.mxu0 %vm228_vm1, %v710_v25  ;;  %v872_v32 = vpop.permute.xlu1 %871 }
  0x99   : > { %v878_v36 = vsel %vm877_vm6, %v872_v32, %v874_v27 }
  0x9a   : > { %v876_v29 = vpop.permute.xlu0 %875 }
  0x9b   : > { %v879_v31 = vsel %vm877_vm6, %v874_v27, %v876_v29 }
  0x9c   : > { %1931 = vmatmul.mubr.msk.f32.vlgmr.msra.gmra.mrb[0].mxu1 %vm224_vm3, %v1856_v28  ;;  %v1045_v35 = vpop.permute.xlu1 %1044 }
  0x9d   : > { %1934 = vmatpush3.msk.msra.mxu1 %vm228_vm1, %v707_v23  ;;  %1935 = vmatprep.mubr.msk.f32.mxu1 %vm2024_vm0, %v2023_v0 }
  0x9e   : > { %1859 = vmatmul.mubr.msk.f32.vlgmr.msra.gmra.mrb[0].mxu0 %vm224_vm3, %v1856_v28  ;;  %1938 = vmatprep.subr.mxu1 %v2023_v0  ;;  %v1043_v33 = vpop.permute.xlu0 %1042 }
  0x9f   : > { %1864 = vmatpush1.msk.msra.mxu0 %vm228_vm1, %v709_v30  ;;  %784 = vmatprep.mubr.f32.mxu0 %v2023_v0  ;;  %v1048_v37 = vsel %vm1046_vm7, %v1043_v33, %v1045_v35 }
  0xa0   : > { %1869 = vmatprep.subr.msk.mxu0 %vm228_vm1, %v879_v31  ;;  %v1212_v39 = vpop.permute.xlu1 %1211 }
  0xa2   : > { %v1041_v38 = vpop.permute.xlu0 %1040 }
  0xa3   : > { %v1047_v42 = vsel %vm1046_vm7, %v1041_v38, %v1043_v33 }
  0xa4   : > { %1936 = vmatmul.mubr.msk.f32.vlgmr.msra.gmra.mrb[0].mxu1 %vm224_vm3, %v1862_v34  ;;  %v1210_v44 = vpop.permute.xlu1 %1209 }
  0xa5   : > { %1939 = vmatpush3.msk.msra.mxu1 %vm228_vm1, %v876_v29  ;;  %1940 = vmatprep.mubr.msk.f32.mxu1 %vm2024_vm0, %v2023_v0  ;;  %v1216_v48 = vsel %vm1215_vm8, %v1210_v44, %v1212_v39 }
  0xa6   : > { %1865 = vmatmul.mubr.msk.f32.vlgmr.msra.gmra.mrb[0].mxu0 %vm224_vm3, %v1862_v34  ;;  %1943 = vmatprep.subr.mxu1 %v2023_v0  ;;  %v1214_v41 = vpop.permute.xlu0 %1213 }
  0xa7   : > { %1870 = vmatpush1.msk.msra.mxu0 %vm228_vm1, %v878_v36  ;;  %953 = vmatprep.mubr.f32.mxu0 %v2023_v0  ;;  %v1217_v43 = vsel %vm1215_vm8, %v1212_v39, %v1214_v41 }
  0xa8   : > { %1875 = vmatprep.subr.msk.mxu0 %vm228_vm1, %v1048_v37  ;;  %v1383_v47 = vpop.permute.xlu1 %1382 }
  0xaa   : > { %v1381_v45 = vpop.permute.xlu0 %1380 }
  0xab   : > { %v1386_v49 = vsel %vm1384_vm9, %v1381_v45, %v1383_v47 }
  0xac   : > { %1941 = vmatmul.mubr.msk.f32.vlgmr.msra.gmra.mrb[0].mxu1 %vm224_vm3, %v1868_v40  ;;  %v1550_v53 = vpop.permute.xlu1 %1549 }
  0xad   : > { %1944 = vmatpush3.msk.msra.mxu1 %vm228_vm1, %v1045_v35  ;;  %1945 = vmatprep.mubr.msk.f32.mxu1 %vm2024_vm0, %v2023_v0 }
  0xae   : > { %1871 = vmatmul.mubr.msk.f32.vlgmr.msra.gmra.mrb[0].mxu0 %vm224_vm3, %v1868_v40  ;;  %1948 = vmatprep.subr.mxu1 %v2023_v0  ;;  %v1379_v50 = vpop.permute.xlu0 %1378 }
  0xaf   : > { %1876 = vmatpush1.msk.msra.mxu0 %vm228_vm1, %v1047_v42  ;;  %1122 = vmatprep.mubr.f32.mxu0 %v2023_v0  ;;  %v1385_v54 = vsel %vm1384_vm9, %v1379_v50, %v1381_v45 }
  0xb0   : > { %1881 = vmatprep.subr.msk.mxu0 %vm228_vm1, %v1217_v43  ;;  %v1548_v56 = vpop.permute.xlu1 %1547 }
  0xb1   : > { %v1554_v58 = vsel %vm1553_vm10, %v1548_v56, %v1550_v53 }
  0xb2   : > { %v1552_v52 = vpop.permute.xlu0 %1551 }
  0xb3   : > { %v1555_v55 = vsel %vm1553_vm10, %v1550_v53, %v1552_v52 }
  0xb4   : > { %1946 = vmatmul.mubr.msk.f32.vlgmr.msra.gmra.mrb[0].mxu1 %vm224_vm3, %v1874_v46 }
  0xb5   : > { %1949 = vmatpush3.msk.msra.mxu1 %vm228_vm1, %v1214_v41  ;;  %1950 = vmatprep.mubr.msk.f32.mxu1 %vm2024_vm0, %v2023_v0 }
  0xb6   : > { %1877 = vmatmul.mubr.msk.f32.vlgmr.msra.gmra.mrb[0].mxu0 %vm224_vm3, %v1874_v46  ;;  %1953 = vmatprep.subr.mxu1 %v2023_v0 }
  0xb7   : > { %1882 = vmatpush1.msk.msra.mxu0 %vm228_vm1, %v1216_v48  ;;  %1291 = vmatprep.mubr.f32.mxu0 %v2023_v0 }
  0xb8   : > { %1887 = vmatprep.subr.msk.mxu0 %vm228_vm1, %v1386_v49 }
  0xbc   : > { %1951 = vmatmul.mubr.msk.f32.vlgmr.msra.gmra.mrb[0].mxu1 %vm224_vm3, %v1880_v51 }
  0xbd   : > { %1954 = vmatpush3.msk.msra.mxu1 %vm228_vm1, %v1383_v47  ;;  %1955 = vmatprep.mubr.msk.f32.mxu1 %vm2024_vm0, %v2023_v0 }
  0xbe   : > { %1883 = vmatmul.mubr.msk.f32.vlgmr.msra.gmra.mrb[0].mxu0 %vm224_vm3, %v1880_v51  ;;  %1958 = vmatprep.subr.mxu1 %v2023_v0 }
  0xbf   : > { %1888 = vmatpush1.msk.msra.mxu0 %vm228_vm1, %v1385_v54  ;;  %1460 = vmatprep.mubr.f32.mxu0 %v2023_v0 }
  0xc0   : > { %1893 = vmatprep.subr.msk.mxu0 %vm228_vm1, %v1555_v55 }
  0xc4   : > { %1956 = vmatmul.mubr.msk.f32.vlgmr.msra.gmra.mrb[0].mxu1 %vm224_vm3, %v1886_v57 }
  0xc5   : > { %1959 = vmatpush3.msk.msra.mxu1 %vm228_vm1, %v1552_v52  ;;  %1960 = vmatprep.mubr.msk.f32.mxu1 %vm2024_vm0, %v2023_v0 }
  0xc6   : > { %1889 = vmatmul.mubr.msk.f32.vlgmr.msra.gmra.mrb[0].mxu0 %vm224_vm3, %v1886_v57 }
  0xc7   : > { %1894 = vmatpush1.msk.msra.mxu0 %vm228_vm1, %v1554_v58  ;;  %1629 = vmatprep.mubr.f32.mxu0 %v2023_v0  ;;  %v1714_v0 = vrot.slane %v1709_v1, %v1713_v63 }
  0xcc   : > { %1961 = vmatmul.mubr.msk.f32.vlgmr.msra.gmra.mrb[0].mxu1 %vm224_vm3, %v1892_v59 }
  0xce   : > { %1895 = vmatmul.mubr.msk.f32.vlgmr.msra.gmra.mrb[0].mxu0 %vm224_vm3, %v1892_v59 }
 0x19f   : > { %v1702_v4 = vpop.f32.mrb[0].mxu1 }
 0x1a0   : > { %v1962_v6 = vpop.f32.mrb[1].mxu1  ;;  %v1728_v8 = vmul.f32 %v1722_v3, %v1702_v4 }
 0x1a1   : > { %v1631_v7 = vpop.f32.mrb[0].mxu0 }
 0x1a2   : > { %v1726_v9 = vmul.f32 %v1714_v0, %v1631_v7  ;;  %v1633_v10 = vpop.f32.mrb[1].mxu0  ;;  %v1731_v13 = vsel %vm1730_vm11, %v1728_v8, 0.0 }
 0x1a3   : > { %v1727_v11 = vmul.f32 %v1718_v5, %v1633_v10 }
 0x1a5   : > { %v1729_v12 = vadd.f32 %v1727_v11, %v1726_v9 }
 0x1a7   : > { %v1732_v14 = vadd.f32 %v1731_v13, %v1729_v12 }
 0x1a9   : > { %1733 = vadd.xlane.f32.xlu0 %v1732_v14 }
 0x236   : > { %v1734_v15 = vpop.xlane.xlu0 %1733 }
 0x237   : > { %v1735_v16 = vmul.f32 0.00390625, %v1734_v15  ;;  %1751 = vst.msk [vmem:[%s202_s28] sm:$0xff] %vm1750_vm12, %v1734_v15 }
 0x239   : > { %v1736_v17 = vsub.f32 %v1631_v7, %v1735_v16  ;;  %v1737_v18 = vsub.f32 %v1633_v10, %v1735_v16  ;;  %v1738_v19 = vsub.f32 %v1702_v4, %v1735_v16 }
 0x23b   : > { %v1739_v20 = vmul.f32 %v1736_v17, %v1714_v0  ;;  %v1740_v21 = vmul.f32 %v1737_v18, %v1718_v5  ;;  %v1741_v22 = vmul.f32 %v1738_v19, %v1722_v3 }
 0x23d   : > { %v1742_v23 = vmul.f32 %v1739_v20, %v1739_v20  ;;  %v1743_v24 = vmul.f32 %v1740_v21, %v1740_v21  ;;  %v1744_v25 = vmul.f32 %v1741_v22, %v1741_v22 }
 0x23f   : > { %v1745_v26 = vadd.f32 %v1743_v24, %v1742_v23  ;;  %v1746_v27 = vsel %vm1730_vm11, %v1744_v25, 0.0 }
 0x241   : > { %v1747_v28 = vadd.f32 %v1746_v27, %v1745_v26 }
 0x243   : > { %1748 = vadd.xlane.f32.xlu1 %v1747_v28 }
 0x2d0   : > { %v1749_v29 = vpop.xlane.xlu1 %1748 }
 0x2d1   : > { %1752 = vst.msk [vmem:[%s206_s30] sm:$0xff] %vm1750_vm12, %v1749_v29 }
 0x2d2 PF: > { %s15_s15 = sadd.s32 1, %s2021_s15  }
 0x2d3   : > { %p12_p4 = scmp.ge.s32.totalorder %s15_s15, 4  }
 0x2d5   :  { %14 = sbr.rel (!%p12_p4) target bundleno = 1 (0x1), region = 82 }

</bundles_post_ra>
